<compile_context>
chip_gen: v6e
topology: v6e:2x2x1
jax: 0.10.0
libtpu: 0.0.40
codegen_flags: <defaults>
</compile_context>

<pallas_src>
import jax
import jax.numpy as jnp
from jax.experimental import pallas as pl
from jax.experimental.pallas import tpu as pltpu


_MIN_KERNEL_ELEMS = 64 * 1024   # below this, fused XLA is already optimal


def _swish_kernel(x_ref, o_ref):
    # Compute in f32 for accuracy (and because v5e has no bf16 VPU/EUP).
    xf = x_ref[...].astype(jnp.float32)
    o_ref[...] = (xf * jax.nn.sigmoid(xf)).astype(o_ref.dtype)


def _cdiv(a, b):
    return -(-a // b)


def _round_up(a, b):
    return _cdiv(a, b) * b


def _target_block_bytes():
    """Generation-aware block bytes, kept inside the scoped-VMEM default."""
    try:
        kind = jax.devices()[0].device_kind.lower()
    except Exception:
        kind = ""
    if "v7" in kind:
        return 6 * 1024 * 1024   # 4x double buffers = 24 MiB <= 32 MiB scoped (64 MiB phys)
    if "v6" in kind:
        return 4 * 1024 * 1024   # 16 MiB live <= 32 MiB scoped default
    return 2 * 1024 * 1024       # v5e & unknown: 8 MiB live <= 16 MiB scoped default


def _sublane_for(itemsize):
    # Sub-32-bit dtypes pack along sublanes: f32 -> 8, bf16 -> 16, int8/fp8 -> 32.
    return {4: 8, 2: 16, 1: 32}.get(itemsize, 8)


def swish(x, *, min_kernel_elems=_MIN_KERNEL_ELEMS):
    """Elementwise Swish: x * sigmoid(x). Any rank, any floating dtype."""
    n = x.size
    if n == 0:
        return x
    if n < min_kernel_elems:
        # Small-tensor fallback: pallas_call fixed cost would dominate.
        xf = x.astype(jnp.float32)
        return (xf * jax.nn.sigmoid(xf)).astype(x.dtype)

    orig_shape = x.shape
    dtype = x.dtype
    itemsize = jnp.dtype(dtype).itemsize
    sublane = _sublane_for(itemsize)

    # Widest lane-dense column count that divides n exactly -> reshape is free,
    # no pad, no output slice.
    lane_cols = None
    for lc in (512, 256, 128):
        if n % lc == 0:
            lane_cols = lc
            break

    x_flat = x.reshape(-1)
    pad = 0
    if lane_cols is None:
        # Last resort for ragged sizes: pad the tail (<=127 elems) up to the
        # next multiple of 128 lanes. swish(0) == 0; the tail is sliced off.
        lane_cols = 128
        pad = (-n) % lane_cols
        x_flat = jnp.pad(x_flat, (0, pad))

    total = n + pad
    rows = total // lane_cols

    # Block sizing: ~target bytes per block, but capped so the parallel grid
    # has >= 4 steps (v7x megacore sharding needs >= 2; 4 balances load).
    block_rows = (_target_block_bytes() // (lane_cols * itemsize)) // sublane * sublane
    block_rows = max(sublane, block_rows)
    block_rows = min(block_rows, _round_up(_cdiv(rows, 4), sublane))
    if rows < sublane:
        block_rows = rows   # full extent along rows (legal: equals array dim)

    grid = (_cdiv(rows, block_rows),)   # partial edge block is masked by Pallas

    x2 = x_flat.reshape(rows, lane_cols)

    out2 = pl.pallas_call(
        _swish_kernel,
        out_shape=jax.ShapeDtypeStruct((rows, lane_cols), dtype),
        grid_spec=pltpu.PrefetchScalarGridSpec(
            num_scalar_prefetch=0,
            grid=grid,
            in_specs=[pl.BlockSpec((block_rows, lane_cols), lambda i: (i, 0))],
            out_specs=pl.BlockSpec((block_rows, lane_cols), lambda i: (i, 0)),
        ),
        compiler_params=pltpu.CompilerParams(
            dimension_semantics=("parallel",),
        ),
        cost_estimate=pl.CostEstimate(
            flops=4 * total,
            transcendentals=total,
            bytes_accessed=2 * total * itemsize,
        ),
    )(x2)

    out_flat = out2.reshape(-1)
    if pad:
        out_flat = out_flat[:n]
    return out_flat.reshape(orig_shape)


if __name__ == "__main__":
    key = jax.random.PRNGKey(0)
    k1, k2, k3, k4 = jax.random.split(key, 4)

    # Primary input: big enough to take the Pallas path (multi-step parallel
    # grid, lane_cols=512, no pad / no slice).
    x = jax.random.normal(k1, (2, 4, 128, 128), dtype=jnp.float32)
    out = jax.block_until_ready(swish(x))
    ref = x * jax.nn.sigmoid(x)
    assert out.shape == x.shape
    assert out.dtype == x.dtype
    assert jnp.allclose(out, ref, atol=1e-6, rtol=1e-6)

    # Small ContextNet-style activation shapes -> fused-XLA fallback path.
    for shape in [(2, 4, 16), (3, 7, 11)]:
        y = jax.random.normal(k2, shape, dtype=jnp.float32)
        out_y = jax.block_until_ready(swish(y))
        ref_y = y * jax.nn.sigmoid(y)
        assert out_y.shape == y.shape
        assert jnp.allclose(out_y, ref_y, atol=1e-6, rtol=1e-6)

    # Ragged large size (n % 128 != 0) -> kernel path with small tail pad.
    z = jax.random.normal(k3, (3, 7, 3333), dtype=jnp.float32)
    out_z = jax.block_until_ready(swish(z))
    ref_z = z * jax.nn.sigmoid(z)
    assert out_z.shape == z.shape
    assert jnp.allclose(out_z, ref_z, atol=1e-6, rtol=1e-6)

    # bf16 path exercises dtype-aware sublane rounding (16-row tiles).
    w = jax.random.normal(k4, (4, 64, 512), dtype=jnp.bfloat16)
    out_w = jax.block_until_ready(swish(w))
    wf = w.astype(jnp.float32)
    ref_w = (wf * jax.nn.sigmoid(wf)).astype(jnp.bfloat16)
    assert out_w.dtype == jnp.bfloat16
    assert jnp.allclose(out_w.astype(jnp.float32), ref_w.astype(jnp.float32),
                        atol=1e-2, rtol=1e-2)

    print("KERNEL_OK")
</pallas_src>

<mosaic_0001>
module attributes {stable_mosaic.version = 11 : i64} {
  func.func @_swish_kernel(%arg0: i32, %arg1: memref<64x512xf32, #tpu.memory_space<vmem>>, %arg2: memref<64x512xf32, #tpu.memory_space<vmem>>) attributes {dimension_semantics = [#tpu.dimension_semantics<parallel>], iteration_bounds = array<i64: 4>, scalar_prefetch = 0 : i64, scratch_operands = 0 : i64, tpu.core_type = #tpu.core_type<tc>, window_params = [{transform_indices = @transform_0, window_bounds = array<i64: 64, 512>}, {transform_indices = @transform_1, window_bounds = array<i64: 64, 512>}]} {
    %c0 = arith.constant 0 : index
    %c0_0 = arith.constant 0 : index
    %0 = vector.load %arg1[%c0, %c0_0] : memref<64x512xf32, #tpu.memory_space<vmem>>, vector<64x512xf32>
    %1 = arith.negf %0 : vector<64x512xf32>
    %2 = math.exp %1 : vector<64x512xf32>
    %cst = arith.constant 1.000000e+00 : f32
    %3 = vector.broadcast %cst : f32 to vector<64x512xf32>
    %4 = arith.addf %3, %2 : vector<64x512xf32>
    %5 = arith.divf %3, %4 : vector<64x512xf32>
    %6 = arith.mulf %0, %5 : vector<64x512xf32>
    %c0_1 = arith.constant 0 : index
    %c0_2 = arith.constant 0 : index
    %7 = vector.load %arg2[%c0_1, %c0_2] : memref<64x512xf32, #tpu.memory_space<vmem>>, vector<64x512xf32>
    tpu.vector_store %arg2[%c0_1, %c0_2], %6 {strides = array<i32>} : memref<64x512xf32, #tpu.memory_space<vmem>>, vector<64x512xf32>,
    return
  }
  func.func @transform_0(%arg0: i32) -> (i32, i32) {
    %c0_i32 = arith.constant 0 : i32
    %c0_i32_0 = arith.constant 0 : i32
    return %arg0, %c0_i32 : i32, i32
  }
  func.func @transform_1(%arg0: i32) -> (i32, i32) {
    %c0_i32 = arith.constant 0 : i32
    %c0_i32_0 = arith.constant 0 : i32
    return %arg0, %c0_i32 : i32, i32
  }
}

</mosaic_0001>

<bundles_post_ra>
// kernel: tpu_custom_call.1
= control target key start
LH: loop header
LB: loop body
LE: loop exit
PB: predicated region body
PF: predicated region fallthrough
CT: control target
= control target key end

     0   :  { %6 = vsyncpa [#allocation3], 0  ;;  %s1207_s0 = inlined_call_operand.hbm [shape: f32[256,512], index: 0, kind: input, shape index: {}]   ;;  %s1208_s1 = inlined_call_operand.hbm [shape: f32[256,512], index: 1, kind: output, shape index: {}]  }
   0x1   :  { %8 = vsyncpa [#allocation3 + $0x1], 0 }
   0x2   :  { %9 = vsyncpa [#allocation4], 0 }
   0x3   :  { %11 = vsyncpa [#allocation4 + $0x1], 0  ;;  %s854_s6 = smov 0   ;;  %s856_s7 = smov 0  }
   0x4   :  { %s858_s8 = smov 0   ;;  %s860_s9 = smov 0  }
   0x5 LB: > { %s875_s10 = sadd.s32 4294967295, %s836_s9   ;;  %s514_s11 = sadd.s32 4294967294, %s836_s9   ;;  %s836_s9 = sphi %s860_s9, %s1222_s9   ;;  %s832_s8 = sphi %s858_s8, %s1221_s8   ;;  %s828_s7 = sphi %s856_s7, %s1220_s7   ;;  %s824_s6 = sphi %s854_s6, %s1219_s6  }
   0x6   : > { %s879_s12 = sadd.s32 1, %s836_s9   ;;  %s24_s13 = sadd.s32 1, %s832_s8 }
   0x7   : > { %s21_s14 = ssub.s32 %s836_s9, %s879_s12  ;;  %p31_p0 = scmp.ne.s32.totalorder %s832_s8, %s828_s7 }
   0x8   : > { %p22_p1 = scmp.eq.s32.totalorder %s21_s14, 0  ;;  %p32_p2 = scmp.eq.s32.totalorder %s836_s9, 0 }
   0x9   : > { %p37_p3 = scmp.ne.s32.totalorder %s828_s7, %s824_s6  ;;  %p38_p4 = scmp.eq.s32.totalorder %s875_s10, 0 }
   0xa   : > { %s891_s15 = scalar_select %p22_p1, %s832_s8, %s24_s13  }
   0xb   : > { %p893_p5 = por %p32_p2, %p31_p0  ;;  %p897_p6 = por %p38_p4, %p37_p3 }
   0xc   : > { %p61_p7 = scmp.eq.s32.totalorder %s875_s10, 3  ;;  %p67_p8 = scmp.eq.s32.totalorder %s514_s11, 3 }
   0xd   : > { %s1212_s17 = scalar_select %p897_p6, 1, 0 }
   0xe   : > { %p578_p9 = scmp.lt.s32.totalorder %s836_s9, 4  ;;  %p903_p10 = por %p61_p7, %p31_p0 }
   0xf   : > { %p907_p11 = por %p67_p8, %p37_p3  ;;  %s87_s20 = sand.u32 1, %s832_s8  }
  0x10   : > { %s1213_s18 = scalar_select %p903_p10, 1, 0 }
  0x11   : > { %s1214_s19 = scalar_select %p907_p11, 1, 0 }
  0x12   : > { %s563_s21 = sshll.u32 %s836_s9, 12  ;;  %s517_s22 = sshll.u32 %s87_s20, 8 }
  0x13   : > { %s916_s25 = scalar_lea.hbm %s1207_s0, %s563_s21  ;;  %s91_s26 = scalar_lea.vmem [#allocation2], %s517_s22 }
  0x14   : > { %s99_s27 = sshll.u32 %s91_s26, 4  ;;  %p920_p12 = pnand %p578_p9, %p893_p5  ;;  %s924_s27 = int_to_ptr.vmem [resolvable:$true] %s99_s27 }
  0x15   : > { %s926_s29 = scalar_lea.sflag [#allocation3], %s87_s20  ;;  %s744_s30 = scalar_lea.hbm %s916_s25, 4096 }
  0x16   : > { %p745_p13 = scmp.ne.s32.totalorder %s916_s25, %s744_s30  ;;  %p746_p0 = pneg %p920_p12 }
  0x17   : > { %s749_s4 = scalar_lea.hbm %s1207_s0, 16384  ;;  %p750_p3 = scmp.lt.s32.totalorder %s916_s25, %s1207_s0 }
  0x18   : > { %p747_p1 = pnand %p746_p0, %p745_p13  ;;  %p751_p4 = scmp.lt.s32.totalorder %s749_s4, %s744_s30 }
  0x1a   : > { %p748_p2 = pneg %p747_p1  ;;  %p752_p5 = por %p751_p4, %p750_p3 }
  0x1c   : > { %p753_p7 = pnand %p752_p5, %p748_p2 }
  0x1e   : > { %756 = shalt.err (!%p753_p7)
}
  0x1f   : > { %s757_s13 = scalar_lea.vmem %s924_s27, 4096  ;;  %s838_s14 = smov [#allocation2]  }
  0x20   : > { %p758_p8 = scmp.ne.s32.totalorder %s924_s27, %s757_s13  ;;  %s762_s16 = sshll.u32 %s838_s14, 4  ;;  %s763_s16 = int_to_ptr.vmem [resolvable:$false] %s762_s16 }
  0x21   : > { %s764_s20 = scalar_lea.vmem %s763_s16, 8192  ;;  %p765_p1 = scmp.lt.s32.totalorder %s924_s27, %s763_s16 }
  0x22   : > { %p760_p9 = pnand %p758_p8, %p746_p0  ;;  %p766_p11 = scmp.lt.s32.totalorder %s764_s20, %s757_s13 }
  0x24   : > { %p761_p13 = pneg %p760_p9  ;;  %p767_p10 = por %p766_p11, %p765_p1 }
  0x26   : > { %p768_p6 = pnand %p767_p10, %p761_p13 }
  0x28   : > { %771 = shalt.err (!%p768_p6)
}
  0x29   : > { %s839_s21 = smov 512   ;;  %s840_s22 = smov 32  }
  0x2a   : > { %573 = dma.hbm_to_vmem [thread:$0]  (!%p920_p12), %s916_s25, 4096, %s924_s27, %s926_s29, %s839_s21, %s839_s21, %s840_s22  }
  0x2b   : > { %p521_p0 = scmp.ge.s32.totalorder %s836_s9, 1  ;;  %p107_p2 = scmp.lt.s32.totalorder %s836_s9, 5 }
  0x2d   : > { %p108_p3 = pnand %p521_p0, %p107_p2 }
  0x2e   : > { %s950_s23 = sand.u32 (!%p108_p3), 1, %s828_s7   ;;  %p1216_p6 = scmp.ne.s32.totalorder (!%p108_p3), %s1212_s17, 0 }
  0x2f   : > { %111 = sbr.rel (%p108_p3) target bundleno = 149 (0x95), region = 24  ;;  %s522_s24 = sshll.u32 (!%p108_p3), %s950_s23, 8 }
  0x30   : > { %s114_s26 = scalar_lea.sflag (!%p108_p3), [#allocation3], %s950_s23  ;;  %s956_s30 = scalar_lea.vmem (!%p108_p3), [#allocation2], %s522_s24 }
  0x34   : > { %815 = dma.done.wait (%p1216_p6), %s114_s26, 4096  }
  0x35   : > { %817 = vsyncadd (%p1216_p6), %s114_s26, 4294963200  ;;  %v963_v0 = vld [vmem:[%s956_s30] sm:$0xff]  ;;  %v966_v1 = vld [vmem:[%s956_s30 + $0x8] sm:$0xff]  ;;  %s1055_s17 = scalar_lea.vmem [#allocation5], %s522_s24  ;;  %s565_s25 = sshll.u32 %s875_s10, 12 }
  0x36   : > { %v969_v2 = vld [vmem:[%s956_s30 + $0x10] sm:$0xff]  ;;  %v524_v3 = vmul.f32 -1.442695, %v963_v0  ;;  %v525_v4 = vmul.f32 -1.442695, %v966_v1  ;;  %v975_v6 = vld [vmem:[%s956_s30 + $0x18] sm:$0xff]  ;;  %s1159_s10 = scalar_lea.hbm %s1208_s1, %s565_s25 }
  0x37   : > { %v526_v5 = vmul.f32 -1.442695, %v969_v2  ;;  %v978_v7 = vld [vmem:[%s956_s30 + $0x20] sm:$0xff]  ;;  %v981_v8 = vld [vmem:[%s956_s30 + $0x28] sm:$0xff]  ;;  %v527_v9 = vmul.f32 -1.442695, %v975_v6 }
  0x38   : > { %616 = vpow2.f32 %v524_v3  ;;  %v528_v10 = vmul.f32 -1.442695, %v978_v7  ;;  %v529_v11 = vmul.f32 -1.442695, %v981_v8  ;;  %v987_v12 = vld [vmem:[%s956_s30 + $0x30] sm:$0xff]  ;;  %v990_v13 = vld [vmem:[%s956_s30 + $0x38] sm:$0xff] }
  0x39   : > { %618 = vpow2.f32 %v525_v4  ;;  %v993_v14 = vld [vmem:[%s956_s30 + $0x40] sm:$0xff]  ;;  %v530_v15 = vmul.f32 -1.442695, %v987_v12  ;;  %v531_v16 = vmul.f32 -1.442695, %v990_v13  ;;  %v998_v17 = vld [vmem:[%s956_s30 + $0x48] sm:$0xff] }
  0x3a   : > { %620 = vpow2.f32 %v526_v5  ;;  %v1001_v18 = vld [vmem:[%s956_s30 + $0x50] sm:$0xff]  ;;  %v532_v19 = vmul.f32 -1.442695, %v993_v14  ;;  %v1005_v20 = vld [vmem:[%s956_s30 + $0x58] sm:$0xff]  ;;  %v533_v21 = vmul.f32 -1.442695, %v998_v17 }
  0x3b   : > { %622 = vpow2.f32 %v527_v9  ;;  %v1009_v22 = vld [vmem:[%s956_s30 + $0x60] sm:$0xff]  ;;  %v534_v23 = vmul.f32 -1.442695, %v1001_v18  ;;  %v1013_v24 = vld [vmem:[%s956_s30 + $0x68] sm:$0xff]  ;;  %v535_v25 = vmul.f32 -1.442695, %v1005_v20 }
  0x3c   : > { %624 = vpow2.f32 %v528_v10  ;;  %v1017_v26 = vld [vmem:[%s956_s30 + $0x70] sm:$0xff]  ;;  %v536_v27 = vmul.f32 -1.442695, %v1009_v22  ;;  %v1021_v28 = vld [vmem:[%s956_s30 + $0x78] sm:$0xff]  ;;  %v537_v29 = vmul.f32 -1.442695, %v1013_v24 }
  0x3d   : > { %626 = vpow2.f32 %v529_v11  ;;  %v538_v30 = vmul.f32 -1.442695, %v1017_v26  ;;  %v539_v31 = vmul.f32 -1.442695, %v1021_v28  ;;  %v1027_v57 = vld [vmem:[%s956_s30 + $0x80] sm:$0xff]  ;;  %v1030_v60 = vld [vmem:[%s956_s30 + $0x88] sm:$0xff] }
  0x3e   : > { %628 = vpow2.f32 %v530_v15  ;;  %v1033_v63 = vld [vmem:[%s956_s30 + $0x90] sm:$0xff]  ;;  %v540_v5 = vmul.f32 -1.442695, %v1027_v57  ;;  %v1037_v9 = vld [vmem:[%s956_s30 + $0x98] sm:$0xff]  ;;  %v541_v15 = vmul.f32 -1.442695, %v1030_v60 }
  0x3f   : > { %630 = vpow2.f32 %v531_v16  ;;  %v1041_v16 = vld [vmem:[%s956_s30 + $0xa0] sm:$0xff]  ;;  %s441_s27 = sshll.u32 %s1055_s17, 4  ;;  %s427_s2 = scalar_lea.sflag [#allocation4], %s950_s23  ;;  %s1161_s27 = int_to_ptr.vmem [resolvable:$true] %s441_s27 }
  0x40   : > { %632 = vpow2.f32 %v532_v19  ;;  %s772_s3 = scalar_lea.vmem %s1161_s27, 4096  ;;  %p1217_p11 = scmp.ne.s32.totalorder %s1213_s18, 0 }
  0x41   : > { %634 = vpow2.f32 %v533_v21  ;;  %p773_p10 = scmp.ne.s32.totalorder %s1161_s27, %s772_s3  ;;  %s841_s4 = smov [#allocation5]  }
  0x42   : > { %636 = vpow2.f32 %v534_v23  ;;  %v542_v23 = vmul.f32 -1.442695, %v1033_v63  ;;  %s776_s5 = sshll.u32 %s841_s4, 4  ;;  %s777_s5 = int_to_ptr.vmem [resolvable:$false] %s776_s5 }
  0x43   : > { %638 = vpow2.f32 %v535_v25  ;;  %v1046_v25 = vld [vmem:[%s956_s30 + $0xa8] sm:$0xff]  ;;  %p774_p12 = pnand %p773_p10, %p1217_p11  ;;  %s778_s11 = scalar_lea.vmem %s777_s5, 8192 }
  0x44   : > { %640 = vpow2.f32 %v536_v27  ;;  %p779_p5 = scmp.lt.s32.totalorder %s1161_s27, %s777_s5  ;;  %p780_p7 = scmp.lt.s32.totalorder %s778_s11, %s772_s3 }
  0x45   : > { %v617_v32 = vpop.eup %616  ;;  %642 = vpow2.f32 %v537_v29  ;;  %p775_p4 = pneg %p774_p12 }
  0x46   : > { %v619_v33 = vpop.eup %618  ;;  %v266_v34 = vadd.f32 1.0, %v617_v32  ;;  %644 = vpow2.f32 %v538_v30  ;;  %v543_v30 = vmul.f32 -1.442695, %v1037_v9  ;;  %p781_p8 = por %p780_p7, %p779_p5 }
  0x47   : > { %v621_v35 = vpop.eup %620  ;;  %v267_v36 = vadd.f32 1.0, %v619_v33  ;;  %646 = vpow2.f32 %v539_v31  ;;  %v1051_v31 = vld [vmem:[%s956_s30 + $0xb0] sm:$0xff]  ;;  %v1061_v33 = vld [vmem:[%s956_s30 + $0xb8] sm:$0xff] }
  0x48   : > { %v623_v37 = vpop.eup %622  ;;  %648 = vrcp.f32 %v266_v34  ;;  %v268_v38 = vadd.f32 1.0, %v621_v35  ;;  %p782_p9 = pnand %p781_p8, %p775_p4 }
  0x49   : > { %v625_v39 = vpop.eup %624  ;;  %650 = vrcp.f32 %v267_v36  ;;  %v269_v40 = vadd.f32 1.0, %v623_v37  ;;  %v545_v36 = vmul.f32 -1.442695, %v1046_v25  ;;  %v1067_v37 = vld [vmem:[%s956_s30 + $0xc0] sm:$0xff] }
  0x4a   : > { %v627_v41 = vpop.eup %626  ;;  %652 = vrcp.f32 %v268_v38  ;;  %v270_v42 = vadd.f32 1.0, %v625_v39  ;;  %v546_v39 = vmul.f32 -1.442695, %v1051_v31 }
  0x4b   : > { %v629_v43 = vpop.eup %628  ;;  %654 = vrcp.f32 %v269_v40  ;;  %v271_v44 = vadd.f32 1.0, %v627_v41  ;;  %v1073_v40 = vld [vmem:[%s956_s30 + $0xc8] sm:$0xff] }
  0x4c   : > { %v631_v45 = vpop.eup %630  ;;  %656 = vrcp.f32 %v270_v42  ;;  %v272_v46 = vadd.f32 1.0, %v629_v43  ;;  %v547_v42 = vmul.f32 -1.442695, %v1061_v33  ;;  %v1079_v43 = vld [vmem:[%s956_s30 + $0xd0] sm:$0xff] }
  0x4d   : > { %v633_v47 = vpop.eup %632  ;;  %658 = vrcp.f32 %v271_v44  ;;  %v273_v48 = vadd.f32 1.0, %v631_v45  ;;  %v548_v45 = vmul.f32 -1.442695, %v1067_v37 }
  0x4e   : > { %v635_v49 = vpop.eup %634  ;;  %660 = vrcp.f32 %v272_v46  ;;  %v274_v50 = vadd.f32 1.0, %v633_v47  ;;  %v1085_v46 = vld [vmem:[%s956_s30 + $0xd8] sm:$0xff] }
  0x4f   : > { %v637_v51 = vpop.eup %636  ;;  %662 = vrcp.f32 %v273_v48  ;;  %v275_v52 = vadd.f32 1.0, %v635_v49  ;;  %v549_v48 = vmul.f32 -1.442695, %v1073_v40  ;;  %v1091_v49 = vld [vmem:[%s956_s30 + $0xe0] sm:$0xff] }
  0x50   : > { %v639_v53 = vpop.eup %638  ;;  %664 = vrcp.f32 %v274_v50  ;;  %v276_v54 = vadd.f32 1.0, %v637_v51  ;;  %v550_v51 = vmul.f32 -1.442695, %v1079_v43 }
  0x51   : > { %v641_v55 = vpop.eup %640  ;;  %666 = vrcp.f32 %v275_v52  ;;  %v277_v56 = vadd.f32 1.0, %v639_v53  ;;  %v1097_v52 = vld [vmem:[%s956_s30 + $0xe8] sm:$0xff] }
  0x52   : > { %v643_v58 = vpop.eup %642  ;;  %668 = vrcp.f32 %v276_v54  ;;  %v278_v59 = vadd.f32 1.0, %v641_v55  ;;  %v551_v54 = vmul.f32 -1.442695, %v1085_v46  ;;  %v1103_v55 = vld [vmem:[%s956_s30 + $0xf0] sm:$0xff] }
  0x53   : > { %v645_v61 = vpop.eup %644  ;;  %670 = vrcp.f32 %v277_v56  ;;  %v279_v62 = vadd.f32 1.0, %v643_v58  ;;  %v552_v58 = vmul.f32 -1.442695, %v1091_v49 }
  0x54   : > { %v647_v3 = vpop.eup %646  ;;  %672 = vrcp.f32 %v278_v59  ;;  %v280_v4 = vadd.f32 1.0, %v645_v61  ;;  %v1109_v59 = vld [vmem:[%s956_s30 + $0xf8] sm:$0xff] }
  0x55   : > { %v649_v10 = vpop.eup %648  ;;  %674 = vrcp.f32 %v279_v62  ;;  %v281_v11 = vadd.f32 1.0, %v647_v3  ;;  %v553_v62 = vmul.f32 -1.442695, %v1097_v52 }
  0x56   : > { %v651_v19 = vpop.eup %650  ;;  %v362_v21 = vmul.f32 %v649_v10, %v963_v0  ;;  %676 = vrcp.f32 %v280_v4 }
  0x57   : > { %v653_v27 = vpop.eup %652  ;;  %v363_v29 = vmul.f32 %v651_v19, %v966_v1  ;;  %678 = vrcp.f32 %v281_v11  ;;  %v544_v1 = vmul.f32 -1.442695, %v1041_v16 }
  0x58   : > { %v655_v32 = vpop.eup %654  ;;  %394 = vst [vmem:[%s1055_s17] sm:$0xff] %v362_v21  ;;  %v364_v0 = vmul.f32 %v653_v27, %v969_v2  ;;  %680 = vpow2.f32 %v540_v5 }
  0x59   : > { %v657_v34 = vpop.eup %656  ;;  %395 = vst [vmem:[%s1055_s17 + $0x8] sm:$0xff] %v363_v29  ;;  %v365_v35 = vmul.f32 %v655_v32, %v975_v6  ;;  %682 = vpow2.f32 %v541_v15 }
  0x5a   : > { %v659_v38 = vpop.eup %658  ;;  %396 = vst [vmem:[%s1055_s17 + $0x10] sm:$0xff] %v364_v0  ;;  %v366_v2 = vmul.f32 %v657_v34, %v978_v7  ;;  %684 = vpow2.f32 %v542_v23 }
  0x5b   : > { %v661_v41 = vpop.eup %660  ;;  %397 = vst [vmem:[%s1055_s17 + $0x18] sm:$0xff] %v365_v35  ;;  %v367_v6 = vmul.f32 %v659_v38, %v981_v8  ;;  %686 = vpow2.f32 %v543_v30 }
  0x5c   : > { %v663_v44 = vpop.eup %662  ;;  %398 = vst [vmem:[%s1055_s17 + $0x20] sm:$0xff] %v366_v2  ;;  %v368_v7 = vmul.f32 %v661_v41, %v987_v12  ;;  %688 = vpow2.f32 %v544_v1 }
  0x5d   : > { %v665_v47 = vpop.eup %664  ;;  %399 = vst [vmem:[%s1055_s17 + $0x28] sm:$0xff] %v367_v6  ;;  %v369_v8 = vmul.f32 %v663_v44, %v990_v13  ;;  %690 = vpow2.f32 %v545_v36 }
  0x5e   : > { %v667_v50 = vpop.eup %666  ;;  %400 = vst [vmem:[%s1055_s17 + $0x30] sm:$0xff] %v368_v7  ;;  %v370_v12 = vmul.f32 %v665_v47, %v993_v14  ;;  %692 = vpow2.f32 %v546_v39 }
  0x5f   : > { %v669_v53 = vpop.eup %668  ;;  %401 = vst [vmem:[%s1055_s17 + $0x38] sm:$0xff] %v369_v8  ;;  %v371_v13 = vmul.f32 %v667_v50, %v998_v17  ;;  %694 = vpow2.f32 %v547_v42 }
  0x60   : > { %v671_v56 = vpop.eup %670  ;;  %402 = vst [vmem:[%s1055_s17 + $0x40] sm:$0xff] %v370_v12  ;;  %v372_v14 = vmul.f32 %v669_v53, %v1001_v18  ;;  %696 = vpow2.f32 %v548_v45  ;;  %v554_v18 = vmul.f32 -1.442695, %v1103_v55 }
  0x61   : > { %v673_v61 = vpop.eup %672  ;;  %403 = vst [vmem:[%s1055_s17 + $0x48] sm:$0xff] %v371_v13  ;;  %v373_v17 = vmul.f32 %v671_v56, %v1005_v20  ;;  %698 = vpow2.f32 %v549_v48  ;;  %v555_v20 = vmul.f32 -1.442695, %v1109_v59 }
  0x62   : > { %v675_v3 = vpop.eup %674  ;;  %404 = vst [vmem:[%s1055_s17 + $0x50] sm:$0xff] %v372_v14  ;;  %v374_v4 = vmul.f32 %v673_v61, %v1009_v22  ;;  %700 = vpow2.f32 %v550_v51 }
  0x63   : > { %v677_v5 = vpop.eup %676  ;;  %405 = vst [vmem:[%s1055_s17 + $0x58] sm:$0xff] %v373_v17  ;;  %v375_v10 = vmul.f32 %v675_v3, %v1013_v24  ;;  %702 = vpow2.f32 %v551_v54 }
  0x64   : > { %v679_v11 = vpop.eup %678  ;;  %406 = vst [vmem:[%s1055_s17 + $0x60] sm:$0xff] %v374_v4  ;;  %v376_v15 = vmul.f32 %v677_v5, %v1017_v26  ;;  %704 = vpow2.f32 %v552_v58 }
  0x65   : > { %v681_v19 = vpop.eup %680  ;;  %407 = vst [vmem:[%s1055_s17 + $0x68] sm:$0xff] %v375_v10  ;;  %v377_v22 = vmul.f32 %v679_v11, %v1021_v28  ;;  %706 = vpow2.f32 %v553_v62 }
  0x66   : > { %v683_v21 = vpop.eup %682  ;;  %408 = vst [vmem:[%s1055_s17 + $0x70] sm:$0xff] %v376_v15  ;;  %v282_v23 = vadd.f32 1.0, %v681_v19  ;;  %708 = vpow2.f32 %v554_v18 }
  0x67   : > { %v685_v27 = vpop.eup %684  ;;  %409 = vst [vmem:[%s1055_s17 + $0x78] sm:$0xff] %v377_v22  ;;  %v283_v24 = vadd.f32 1.0, %v683_v21  ;;  %710 = vpow2.f32 %v555_v20 }
  0x68   : > { %v687_v29 = vpop.eup %686  ;;  %712 = vrcp.f32 %v282_v23  ;;  %v284_v30 = vadd.f32 1.0, %v685_v27 }
  0x69   : > { %v689_v32 = vpop.eup %688  ;;  %714 = vrcp.f32 %v283_v24  ;;  %v285_v26 = vadd.f32 1.0, %v687_v29 }
  0x6a   : > { %v691_v0 = vpop.eup %690  ;;  %716 = vrcp.f32 %v284_v30  ;;  %v286_v1 = vadd.f32 1.0, %v689_v32 }
  0x6b   : > { %v693_v34 = vpop.eup %692  ;;  %718 = vrcp.f32 %v285_v26  ;;  %v287_v28 = vadd.f32 1.0, %v691_v0 }
  0x6c   : > { %v695_v35 = vpop.eup %694  ;;  %720 = vrcp.f32 %v286_v1  ;;  %v288_v36 = vadd.f32 1.0, %v693_v34 }
  0x6d   : > { %v697_v38 = vpop.eup %696  ;;  %722 = vrcp.f32 %v287_v28  ;;  %v289_v2 = vadd.f32 1.0, %v695_v35 }
  0x6e   : > { %v699_v39 = vpop.eup %698  ;;  %724 = vrcp.f32 %v288_v36  ;;  %v290_v41 = vadd.f32 1.0, %v697_v38 }
  0x6f   : > { %v701_v6 = vpop.eup %700  ;;  %726 = vrcp.f32 %v289_v2  ;;  %v291_v42 = vadd.f32 1.0, %v699_v39 }
  0x70   : > { %v703_v44 = vpop.eup %702  ;;  %728 = vrcp.f32 %v290_v41  ;;  %v292_v7 = vadd.f32 1.0, %v701_v6 }
  0x71   : > { %v705_v45 = vpop.eup %704  ;;  %730 = vrcp.f32 %v291_v42  ;;  %v293_v47 = vadd.f32 1.0, %v703_v44 }
  0x72   : > { %v707_v8 = vpop.eup %706  ;;  %732 = vrcp.f32 %v292_v7  ;;  %v294_v48 = vadd.f32 1.0, %v705_v45 }
  0x73   : > { %v709_v50 = vpop.eup %708  ;;  %734 = vrcp.f32 %v293_v47  ;;  %v295_v12 = vadd.f32 1.0, %v707_v8 }
  0x74   : > { %v711_v51 = vpop.eup %710  ;;  %736 = vrcp.f32 %v294_v48  ;;  %v296_v53 = vadd.f32 1.0, %v709_v50 }
  0x75   : > { %v713_v13 = vpop.eup %712  ;;  %738 = vrcp.f32 %v295_v12  ;;  %v297_v54 = vadd.f32 1.0, %v711_v51 }
  0x76   : > { %v715_v56 = vpop.eup %714  ;;  %v378_v14 = vmul.f32 %v713_v13, %v1027_v57  ;;  %740 = vrcp.f32 %v296_v53 }
  0x77   : > { %v717_v58 = vpop.eup %716  ;;  %v379_v61 = vmul.f32 %v715_v56, %v1030_v60  ;;  %742 = vrcp.f32 %v297_v54 }
  0x78   : > { %v719_v17 = vpop.eup %718  ;;  %410 = vst [vmem:[%s1055_s17 + $0x80] sm:$0xff] %v378_v14  ;;  %v380_v62 = vmul.f32 %v717_v58, %v1033_v63 }
  0x79   : > { %v721_v3 = vpop.eup %720  ;;  %411 = vst [vmem:[%s1055_s17 + $0x88] sm:$0xff] %v379_v61  ;;  %v381_v4 = vmul.f32 %v719_v17, %v1037_v9 }
  0x7a   : > { %v723_v18 = vpop.eup %722  ;;  %412 = vst [vmem:[%s1055_s17 + $0x90] sm:$0xff] %v380_v62  ;;  %v382_v57 = vmul.f32 %v721_v3, %v1041_v16 }
  0x7b   : > { %v725_v5 = vpop.eup %724  ;;  %413 = vst [vmem:[%s1055_s17 + $0x98] sm:$0xff] %v381_v4  ;;  %v383_v60 = vmul.f32 %v723_v18, %v1046_v25 }
  0x7c   : > { %v727_v10 = vpop.eup %726  ;;  %414 = vst [vmem:[%s1055_s17 + $0xa0] sm:$0xff] %v382_v57  ;;  %v384_v63 = vmul.f32 %v725_v5, %v1051_v31 }
  0x7d   : > { %v729_v20 = vpop.eup %728  ;;  %415 = vst [vmem:[%s1055_s17 + $0xa8] sm:$0xff] %v383_v60  ;;  %v385_v9 = vmul.f32 %v727_v10, %v1061_v33 }
  0x7e   : > { %v731_v11 = vpop.eup %730  ;;  %416 = vst [vmem:[%s1055_s17 + $0xb0] sm:$0xff] %v384_v63  ;;  %v386_v16 = vmul.f32 %v729_v20, %v1067_v37 }
  0x7f   : > { %v733_v15 = vpop.eup %732  ;;  %417 = vst [vmem:[%s1055_s17 + $0xb8] sm:$0xff] %v385_v9  ;;  %v387_v25 = vmul.f32 %v731_v11, %v1073_v40 }
  0x80   : > { %v735_v19 = vpop.eup %734  ;;  %418 = vst [vmem:[%s1055_s17 + $0xc0] sm:$0xff] %v386_v16  ;;  %v388_v31 = vmul.f32 %v733_v15, %v1079_v43 }
  0x81   : > { %v737_v22 = vpop.eup %736  ;;  %419 = vst [vmem:[%s1055_s17 + $0xc8] sm:$0xff] %v387_v25  ;;  %v389_v33 = vmul.f32 %v735_v19, %v1085_v46 }
  0x82   : > { %v739_v37 = vpop.eup %738  ;;  %420 = vst [vmem:[%s1055_s17 + $0xd0] sm:$0xff] %v388_v31  ;;  %v390_v21 = vmul.f32 %v737_v22, %v1091_v49 }
  0x83   : > { %v741_v40 = vpop.eup %740  ;;  %421 = vst [vmem:[%s1055_s17 + $0xd8] sm:$0xff] %v389_v33  ;;  %v391_v23 = vmul.f32 %v739_v37, %v1097_v52 }
  0x84   : > { %v743_v43 = vpop.eup %742  ;;  %422 = vst [vmem:[%s1055_s17 + $0xe0] sm:$0xff] %v390_v21  ;;  %v392_v27 = vmul.f32 %v741_v40, %v1103_v55 }
  0x85   : > { %423 = vst [vmem:[%s1055_s17 + $0xe8] sm:$0xff] %v391_v23  ;;  %v393_v46 = vmul.f32 %v743_v43, %v1109_v59 }
  0x86   : > { %424 = vst [vmem:[%s1055_s17 + $0xf0] sm:$0xff] %v392_v27 }
  0x87   : > { %425 = vst [vmem:[%s1055_s17 + $0xf8] sm:$0xff] %v393_v46 }
  0x88   : > { %785 = shalt.err (!%p782_p9)
}
  0x89   : > { %s786_s13 = scalar_lea.hbm %s1159_s10, 4096  ;;  %s790_s20 = scalar_lea.hbm %s1208_s1, 16384 }
  0x8a   : > { %p787_p13 = scmp.ne.s32.totalorder %s1159_s10, %s786_s13  ;;  %p791_p2 = scmp.lt.s32.totalorder %s1159_s10, %s1208_s1 }
  0x8b   : > { %p792_p3 = scmp.lt.s32.totalorder %s790_s20, %s786_s13 }
  0x8c   : > { %p788_p1 = pnand %p787_p13, %p1217_p11 }
  0x8d   : > { %p793_p6 = por %p792_p3, %p791_p2 }
  0x8e   : > { %p789_p0 = pneg %p788_p1 }
  0x90   : > { %p794_p10 = pnand %p793_p6, %p789_p0 }
  0x92   : > { %797 = shalt.err (!%p794_p10)
}
  0x93   : > { %s842_s24 = smov 512   ;;  %s843_s26 = smov 32  }
  0x94   : > { %568 = dma.vmem_to_hbm [thread:$0]  (%p1217_p11), %s1161_s27, 4096, %s1159_s10, %s427_s2, %s842_s24, %s842_s24, %s843_s26  }
  0x95 PF: > { %p579_p12 = scmp.ge.s32.totalorder %s836_s9, 2  ;;  %s456_s30 = sand.u32 1, %s824_s6  }
  0x96   : > { %p1218_p4 = scmp.ne.s32.totalorder %s1214_s19, 0  ;;  %s457_s17 = scalar_lea.sflag [#allocation4], %s456_s30 }
  0x98   : > { %p575_p5 = pnand %p579_p12, %p1218_p4 }
  0x9a   : > { %p576_p7 = pneg %p575_p5 }
  0x9c   : > { %819 = dma.done.wait (%p576_p7), %s457_s17, 4096  }
  0x9d   : > { %821 = vsyncadd (%p576_p7), %s457_s17, 4294963200  ;;  %p14_p8 = scmp.ge.s32.totalorder %s879_s12, 6   ;;  %s1219_s6 = smov %s828_s7 }
  0x9e   : > { %s1220_s7 = smov %s832_s8  ;;  %s1221_s8 = smov %s891_s15 }
  0x9f   : > { %s1222_s9 = smov %s879_s12  ;;  %16 = sbr.rel (!%p14_p8) target bundleno = 5 (0x5), region = 69 }
  0xa4   :  { %462 = vsyncpa [#allocation3], 1 }
  0xa5   :  { %464 = vsyncpa [#allocation3 + $0x1], 1 }
  0xa6   :  { %465 = vsyncpa [#allocation4], 1 }
  0xa7   :  { %467 = vsyncpa [#allocation4 + $0x1], 1 }

</bundles_post_ra>
